<compile_context>
chip_gen: v7x
topology: tpu7x:2x2x1
jax: 0.10.0
libtpu: 0.0.40
codegen_flags: <defaults>
</compile_context>

<pallas_src>
import jax
import jax.numpy as jnp
from jax.experimental import pallas as pl
from jax.experimental.pallas import tpu as pltpu

LEAKY_SLOPE = 0.2
LAMBDA_GP = 10.0


def _round_up(x, m):
    return ((x + m - 1) // m) * m


# ------------------------------ Pallas kernel ------------------------------ #

def _d_loss_kernel(real_ref, fake_ref, alpha_ref, w1_ref, b1_ref, w2t_ref,
                   gram_ref, fake_out_ref, real_out_ref, sumsq_out_ref,
                   acc_fake, acc_real, acc_interp):
    # grid = (batch_tiles, k_tiles); K is the reduction axis.
    k = pl.program_id(1)

    @pl.when(k == 0)
    def _():
        acc_fake[...] = jnp.zeros_like(acc_fake)
        acc_real[...] = jnp.zeros_like(acc_real)
        acc_interp[...] = jnp.zeros_like(acc_interp)

    w1 = w1_ref[...]                                     # [tk, Hp] bf16
    real = real_ref[...]                                 # [tb, tk] bf16
    fake = fake_ref[...]                                 # [tb, tk] bf16
    alpha = alpha_ref[...]                               # [tb, 1]  f32

    # Pre-activation partial sums (bf16 operands, f32 MXU accumulation).
    acc_fake[...] += jnp.dot(fake, w1, preferred_element_type=jnp.float32)
    acc_real[...] += jnp.dot(real, w1, preferred_element_type=jnp.float32)
    # Fused alpha-interpolation (f32 VPU blend, bf16 matmul operand).
    interp = (alpha * real.astype(jnp.float32)
              + (1.0 - alpha) * fake.astype(jnp.float32)).astype(jnp.bfloat16)
    acc_interp[...] += jnp.dot(interp, w1, preferred_element_type=jnp.float32)

    @pl.when(k == pl.num_programs(1) - 1)
    def _():
        b1 = b1_ref[...]                                 # [1, Hp] f32
        w2t = w2t_ref[...]                               # [1, Hp] f32

        # --- forward scores (b2 cancels in the WGAN loss; added glue-side) ---
        pre_f = acc_fake[...] + b1
        pre_r = acc_real[...] + b1
        h_f = jnp.where(pre_f > 0, pre_f, LEAKY_SLOPE * pre_f)   # leaky_relu
        h_r = jnp.where(pre_r > 0, pre_r, LEAKY_SLOPE * pre_r)
        # [B,H]@[H,1] replaced by a VPU/XLU reduction (frees the MXU).
        fake_out_ref[...] = jnp.sum(h_f * w2t, axis=-1, keepdims=True)
        real_out_ref[...] = jnp.sum(h_r * w2t, axis=-1, keepdims=True)

        # --- gradient-penalty hot path ---
        # dD/dx = (leaky_relu'(pre) * w2^T) @ W1^T
        # ||dD/dx||^2 = sum((dpre @ G) * dpre, -1) with G = W1^T @ W1 ([Hp,Hp]),
        # avoiding any [B, D] intermediate and a second copy of W1.
        pre_i = acc_interp[...] + b1
        dact = jnp.where(pre_i > 0, 1.0, LEAKY_SLOPE)    # torch subgradient conv.
        dpre = dact * w2t                                # [tb, Hp]
        dg = jnp.dot(dpre, gram_ref[...], preferred_element_type=jnp.float32)
        sumsq_out_ref[...] = jnp.sum(dg * dpre, axis=-1, keepdims=True)


# ------------------------------ host wrappers ------------------------------ #

def make_disc_params(key, d_in, hidden, tk=512):
    """Deterministic 2-layer MLP discriminator + padded/derived Pallas operands."""
    k1, k2 = jax.random.split(key)
    w1 = (jax.random.normal(k1, (d_in, hidden), jnp.float32)
          / jnp.sqrt(jnp.float32(d_in)))
    b1 = jnp.zeros((hidden,), jnp.float32)
    w2 = (jax.random.normal(k2, (hidden, 1), jnp.float32)
          / jnp.sqrt(jnp.float32(hidden)))
    b2 = jnp.zeros((), jnp.float32)

    hp = _round_up(hidden, 128)          # lane-dense hidden dim
    dp = _round_up(d_in, tk)             # K padded to a multiple of the K tile
    w1p_f32 = jnp.zeros((dp, hp), jnp.float32).at[:d_in, :hidden].set(w1)
    b1p = jnp.zeros((1, hp), jnp.float32).at[0, :hidden].set(b1)
    w2tp = jnp.zeros((1, hp), jnp.float32).at[0, :hidden].set(w2[:, 0])
    gram = jnp.dot(w1p_f32.T, w1p_f32)   # [Hp, Hp], f32 (zero in padded rows/cols)

    return {
        "w1": w1, "b1": b1, "w2": w2, "b2": b2,
        "w1p": w1p_f32.astype(jnp.bfloat16),   # bf16 matmul operand
        "b1p": b1p, "w2tp": w2tp, "gram": gram,
        "tk": tk,
    }


def disc_fused(real_flat, fake_flat, alpha, params):
    """Fused D(real), D(fake) and ||dD/dx(interp)||^2 in one K-tiled pallas_call."""
    B, D = real_flat.shape
    w1p = params["w1p"]
    Dp, Hp = w1p.shape
    tk = params["tk"]

    if Dp != D:  # zero-pad the reduction dim (zeros don't affect x@W1 or Gram)
        pad = ((0, 0), (0, Dp - D))
        real_flat = jnp.pad(real_flat, pad)
        fake_flat = jnp.pad(fake_flat, pad)
    real_bf = real_flat.astype(jnp.bfloat16)
    fake_bf = fake_flat.astype(jnp.bfloat16)

    # Batch tile: multiple of 8 when possible, otherwise the full (small) batch.
    if B % 128 == 0:
        tb = 128
    elif B % 8 == 0:
        tb = 8
    else:
        tb = B
    grid = (B // tb, Dp // tk)

    out_spec = pl.BlockSpec((tb, 1), lambda b, k: (b, 0))
    out_shape = [jax.ShapeDtypeStruct((B, 1), jnp.float32)] * 3

    fake_pred, real_pred, sumsq = pl.pallas_call(
        _d_loss_kernel,
        out_shape=out_shape,
        grid_spec=pltpu.PrefetchScalarGridSpec(
            num_scalar_prefetch=0,
            grid=grid,
            in_specs=[
                pl.BlockSpec((tb, tk), lambda b, k: (b, k)),   # real tile
                pl.BlockSpec((tb, tk), lambda b, k: (b, k)),   # fake tile
                pl.BlockSpec((tb, 1), lambda b, k: (b, 0)),    # alpha
                pl.BlockSpec((tk, Hp), lambda b, k: (k, 0)),   # W1 tile
                pl.BlockSpec((1, Hp), lambda b, k: (0, 0)),    # b1
                pl.BlockSpec((1, Hp), lambda b, k: (0, 0)),    # w2^T
                pl.BlockSpec((Hp, Hp), lambda b, k: (0, 0)),   # G = W1^T W1
            ],
            out_specs=[out_spec, out_spec, out_spec],
            scratch_shapes=[pltpu.VMEM((tb, Hp), jnp.float32)] * 3,
        ),
        compiler_params=pltpu.CompilerParams(
            dimension_semantics=("parallel", "arbitrary")),
    )(real_bf, fake_bf, alpha, w1p, params["b1p"], params["w2tp"], params["gram"])
    return fake_pred, real_pred, sumsq


# ------------------------------- D_Loss glue -------------------------------- #

def d_loss_forward(rgb, generated_image, params, alpha_key,
                   train_d=True, lambda_gp=LAMBDA_GP):
    """Mirrors D_Loss.forward with mode='train' (W_GAN_Loss + Gradient_Penalty)."""
    real = rgb[:, 2]                          # [B, C, H, W]
    fake = generated_image                    # [B, C, H, W]
    B = real.shape[0]
    real_flat = real.reshape(B, -1).astype(jnp.float32)
    fake_flat = fake.reshape(B, -1).astype(jnp.float32)
    alpha = jax.random.uniform(alpha_key, (B, 1), jnp.float32)

    fake_pred, real_pred, sumsq = disc_fused(real_flat, fake_flat, alpha, params)
    # b2 cancels inside mean(fake) - mean(real) but is added back so the
    # individual predictions keep the full D(x) semantics.
    fake_pred = fake_pred + params["b2"]
    real_pred = real_pred + params["b2"]

    if train_d:
        wgan = jnp.mean(fake_pred) - jnp.mean(real_pred)
    else:
        wgan = jnp.mean(real_pred) - jnp.mean(fake_pred)

    total = wgan
    if train_d:
        # TODO(synk): add an epsilon under the sqrt if this is ever differentiated.
        gnorm = jnp.sqrt(jnp.maximum(sumsq, 0.0))          # torch: grad.norm(2, dim=1)
        gp = lambda_gp * jnp.mean((gnorm - 1.0) ** 2)
        total = total + gp
    return total


# ----------------------------------- main ----------------------------------- #

if __name__ == "__main__":
    B, T, C, H, W = 2, 3, 3, 16, 16
    HIDDEN = 32
    D_IN = C * H * W

    key = jax.random.PRNGKey(0)
    k_rgb, k_gen, k_alpha, k_params = jax.random.split(key, 4)

    rgb = jax.random.normal(k_rgb, (B, T, C, H, W), jnp.float32)      # inputs['rgb']
    generated_image = jax.random.normal(k_gen, (B, C, H, W), jnp.float32)
    params = make_disc_params(k_params, D_IN, HIDDEN)

    loss_fn = jax.jit(lambda r, g, a: d_loss_forward(r, g, params, a, train_d=True))
    loss = loss_fn(rgb, generated_image, k_alpha)
    jax.block_until_ready(loss)
    assert loss.shape == () and bool(jnp.isfinite(loss))
    print("KERNEL_OK")
</pallas_src>

<mosaic_0001>
module attributes {stable_mosaic.version = 11 : i64} {
  func.func @_d_loss_kernel(%arg0: i32, %arg1: i32, %arg2: memref<2x512xbf16, #tpu.memory_space<vmem>>, %arg3: memref<2x512xbf16, #tpu.memory_space<vmem>>, %arg4: memref<2x1xf32, #tpu.memory_space<vmem>>, %arg5: memref<512x128xbf16, #tpu.memory_space<vmem>>, %arg6: memref<1x128xf32, #tpu.memory_space<vmem>>, %arg7: memref<1x128xf32, #tpu.memory_space<vmem>>, %arg8: memref<128x128xf32, #tpu.memory_space<vmem>>, %arg9: memref<2x1xf32, #tpu.memory_space<vmem>>, %arg10: memref<2x1xf32, #tpu.memory_space<vmem>>, %arg11: memref<2x1xf32, #tpu.memory_space<vmem>>, %arg12: memref<2x128xf32, #tpu.memory_space<vmem>>, %arg13: memref<2x128xf32, #tpu.memory_space<vmem>>, %arg14: memref<2x128xf32, #tpu.memory_space<vmem>>) attributes {dimension_semantics = [#tpu.dimension_semantics<parallel>, #tpu.dimension_semantics<arbitrary>], iteration_bounds = array<i64: 1, 2>, scalar_prefetch = 0 : i64, scratch_operands = 3 : i64, tpu.core_type = #tpu.core_type<tc>, window_params = [{transform_indices = @transform_0, window_bounds = array<i64: 2, 512>}, {transform_indices = @transform_1, window_bounds = array<i64: 2, 512>}, {transform_indices = @transform_2, window_bounds = array<i64: 2, 1>}, {transform_indices = @transform_3, window_bounds = array<i64: 512, 128>}, {pipeline_mode = #tpu.pipeline_mode<synchronous>, transform_indices = @transform_4, window_bounds = array<i64: 1, 128>}, {pipeline_mode = #tpu.pipeline_mode<synchronous>, transform_indices = @transform_5, window_bounds = array<i64: 1, 128>}, {pipeline_mode = #tpu.pipeline_mode<synchronous>, transform_indices = @transform_6, window_bounds = array<i64: 128, 128>}, {transform_indices = @transform_7, window_bounds = array<i64: 2, 1>}, {transform_indices = @transform_8, window_bounds = array<i64: 2, 1>}, {transform_indices = @transform_9, window_bounds = array<i64: 2, 1>}]} {
    %c0_i32 = arith.constant 0 : i32
    %0 = arith.cmpi eq, %arg1, %c0_i32 : i32
    %1 = arith.extui %0 : i1 to i32
    %c0_i32_0 = arith.constant 0 : i32
    %2 = arith.cmpi ne, %1, %c0_i32_0 : i32
    scf.if %2 {
      %cst_24 = arith.constant 0.000000e+00 : f32
      %32 = vector.broadcast %cst_24 : f32 to vector<2x128xf32>
      %c0_25 = arith.constant 0 : index
      %c0_26 = arith.constant 0 : index
      %33 = vector.load %arg12[%c0_25, %c0_26] : memref<2x128xf32, #tpu.memory_space<vmem>>, vector<2x128xf32>
      tpu.vector_store %arg12[%c0_25, %c0_26], %32 {strides = array<i32>} : memref<2x128xf32, #tpu.memory_space<vmem>>, vector<2x128xf32>,
      %cst_27 = arith.constant 0.000000e+00 : f32
      %34 = vector.broadcast %cst_27 : f32 to vector<2x128xf32>
      %c0_28 = arith.constant 0 : index
      %c0_29 = arith.constant 0 : index
      %35 = vector.load %arg13[%c0_28, %c0_29] : memref<2x128xf32, #tpu.memory_space<vmem>>, vector<2x128xf32>
      tpu.vector_store %arg13[%c0_28, %c0_29], %34 {strides = array<i32>} : memref<2x128xf32, #tpu.memory_space<vmem>>, vector<2x128xf32>,
      %cst_30 = arith.constant 0.000000e+00 : f32
      %36 = vector.broadcast %cst_30 : f32 to vector<2x128xf32>
      %c0_31 = arith.constant 0 : index
      %c0_32 = arith.constant 0 : index
      %37 = vector.load %arg14[%c0_31, %c0_32] : memref<2x128xf32, #tpu.memory_space<vmem>>, vector<2x128xf32>
      tpu.vector_store %arg14[%c0_31, %c0_32], %36 {strides = array<i32>} : memref<2x128xf32, #tpu.memory_space<vmem>>, vector<2x128xf32>,
    } else {
    }
    %c0 = arith.constant 0 : index
    %c0_1 = arith.constant 0 : index
    %3 = vector.load %arg5[%c0, %c0_1] : memref<512x128xbf16, #tpu.memory_space<vmem>>, vector<512x128xbf16>
    %c0_2 = arith.constant 0 : index
    %c0_3 = arith.constant 0 : index
    %4 = vector.load %arg2[%c0_2, %c0_3] : memref<2x512xbf16, #tpu.memory_space<vmem>>, vector<2x512xbf16>
    %c0_4 = arith.constant 0 : index
    %c0_5 = arith.constant 0 : index
    %5 = vector.load %arg3[%c0_4, %c0_5] : memref<2x512xbf16, #tpu.memory_space<vmem>>, vector<2x512xbf16>
    %c0_6 = arith.constant 0 : index
    %c0_7 = arith.constant 0 : index
    %6 = vector.load %arg4[%c0_6, %c0_7] : memref<2x1xf32, #tpu.memory_space<vmem>>, vector<2x1xf32>
    %c0_8 = arith.constant 0 : index
    %c0_9 = arith.constant 0 : index
    %7 = vector.load %arg12[%c0_8, %c0_9] : memref<2x128xf32, #tpu.memory_space<vmem>>, vector<2x128xf32>
    %cst = arith.constant dense<0.000000e+00> : vector<2x128xf32>
    %8 = tpu.matmul %5, %3, %cst {dimension_numbers = #tpu.dot_dimension_numbers<[1], [0], [0], [1], [0, 0, 1, 1], [], []>} : vector<2x512xbf16>, vector<512x128xbf16>, vector<2x128xf32> -> vector<2x128xf32>
    %9 = arith.addf %7, %8 : vector<2x128xf32>
    %c0_10 = arith.constant 0 : index
    %c0_11 = arith.constant 0 : index
    %10 = vector.load %arg12[%c0_10, %c0_11] : memref<2x128xf32, #tpu.memory_space<vmem>>, vector<2x128xf32>
    tpu.vector_store %arg12[%c0_10, %c0_11], %9 {strides = array<i32>} : memref<2x128xf32, #tpu.memory_space<vmem>>, vector<2x128xf32>,
    %c0_12 = arith.constant 0 : index
    %c0_13 = arith.constant 0 : index
    %11 = vector.load %arg13[%c0_12, %c0_13] : memref<2x128xf32, #tpu.memory_space<vmem>>, vector<2x128xf32>
    %cst_14 = arith.constant dense<0.000000e+00> : vector<2x128xf32>
    %12 = tpu.matmul %4, %3, %cst_14 {dimension_numbers = #tpu.dot_dimension_numbers<[1], [0], [0], [1], [0, 0, 1, 1], [], []>} : vector<2x512xbf16>, vector<512x128xbf16>, vector<2x128xf32> -> vector<2x128xf32>
    %13 = arith.addf %11, %12 : vector<2x128xf32>
    %c0_15 = arith.constant 0 : index
    %c0_16 = arith.constant 0 : index
    %14 = vector.load %arg13[%c0_15, %c0_16] : memref<2x128xf32, #tpu.memory_space<vmem>>, vector<2x128xf32>
    tpu.vector_store %arg13[%c0_15, %c0_16], %13 {strides = array<i32>} : memref<2x128xf32, #tpu.memory_space<vmem>>, vector<2x128xf32>,
    %15 = arith.extf %4 : vector<2x512xbf16> to vector<2x512xf32>
    %16 = vector.broadcast %6 : vector<2x1xf32> to vector<2x512xf32>
    %17 = arith.mulf %16, %15 : vector<2x512xf32>
    %cst_17 = arith.constant 1.000000e+00 : f32
    %18 = vector.broadcast %cst_17 : f32 to vector<2x1xf32>
    %19 = arith.subf %18, %6 : vector<2x1xf32>
    %20 = arith.extf %5 : vector<2x512xbf16> to vector<2x512xf32>
    %21 = vector.broadcast %19 : vector<2x1xf32> to vector<2x512xf32>
    %22 = arith.mulf %21, %20 : vector<2x512xf32>
    %23 = arith.addf %17, %22 : vector<2x512xf32>
    %24 = arith.truncf %23 : vector<2x512xf32> to vector<2x512xbf16>
    %c0_18 = arith.constant 0 : index
    %c0_19 = arith.constant 0 : index
    %25 = vector.load %arg14[%c0_18, %c0_19] : memref<2x128xf32, #tpu.memory_space<vmem>>, vector<2x128xf32>
    %cst_20 = arith.constant dense<0.000000e+00> : vector<2x128xf32>
    %26 = tpu.matmul %24, %3, %cst_20 {dimension_numbers = #tpu.dot_dimension_numbers<[1], [0], [0], [1], [0, 0, 1, 1], [], []>} : vector<2x512xbf16>, vector<512x128xbf16>, vector<2x128xf32> -> vector<2x128xf32>
    %27 = arith.addf %25, %26 : vector<2x128xf32>
    %c0_21 = arith.constant 0 : index
    %c0_22 = arith.constant 0 : index
    %28 = vector.load %arg14[%c0_21, %c0_22] : memref<2x128xf32, #tpu.memory_space<vmem>>, vector<2x128xf32>
    tpu.vector_store %arg14[%c0_21, %c0_22], %27 {strides = array<i32>} : memref<2x128xf32, #tpu.memory_space<vmem>>, vector<2x128xf32>,
    %c1_i32 = arith.constant 1 : i32
    %29 = arith.cmpi eq, %arg1, %c1_i32 : i32
    %30 = arith.extui %29 : i1 to i32
    %c0_i32_23 = arith.constant 0 : i32
    %31 = arith.cmpi ne, %30, %c0_i32_23 : i32
    scf.if %31 {
      %c0_24 = arith.constant 0 : index
      %c0_25 = arith.constant 0 : index
      %32 = vector.load %arg6[%c0_24, %c0_25] : memref<1x128xf32, #tpu.memory_space<vmem>>, vector<1x128xf32>
      %c0_26 = arith.constant 0 : index
      %c0_27 = arith.constant 0 : index
      %33 = vector.load %arg7[%c0_26, %c0_27] : memref<1x128xf32, #tpu.memory_space<vmem>>, vector<1x128xf32>
      %c0_28 = arith.constant 0 : index
      %c0_29 = arith.constant 0 : index
      %34 = vector.load %arg12[%c0_28, %c0_29] : memref<2x128xf32, #tpu.memory_space<vmem>>, vector<2x128xf32>
      %35 = vector.broadcast %32 : vector<1x128xf32> to vector<2x128xf32>
      %36 = arith.addf %34, %35 : vector<2x128xf32>
      %c0_30 = arith.constant 0 : index
      %c0_31 = arith.constant 0 : index
      %37 = vector.load %arg13[%c0_30, %c0_31] : memref<2x128xf32, #tpu.memory_space<vmem>>, vector<2x128xf32>
      %38 = vector.broadcast %32 : vector<1x128xf32> to vector<2x128xf32>
      %39 = arith.addf %37, %38 : vector<2x128xf32>
      %cst_32 = arith.constant 0.000000e+00 : f32
      %40 = vector.broadcast %cst_32 : f32 to vector<2x128xf32>
      %41 = arith.cmpf ogt, %36, %40 : vector<2x128xf32>
      %cst_33 = arith.constant 2.000000e-01 : f32
      %42 = vector.broadcast %cst_33 : f32 to vector<2x128xf32>
      %43 = arith.mulf %42, %36 : vector<2x128xf32>
      %44 = arith.select %41, %36, %43 : vector<2x128xi1>, vector<2x128xf32>
      %cst_34 = arith.constant 0.000000e+00 : f32
      %45 = vector.broadcast %cst_34 : f32 to vector<2x128xf32>
      %46 = arith.cmpf ogt, %39, %45 : vector<2x128xf32>
      %cst_35 = arith.constant 2.000000e-01 : f32
      %47 = vector.broadcast %cst_35 : f32 to vector<2x128xf32>
      %48 = arith.mulf %47, %39 : vector<2x128xf32>
      %49 = arith.select %46, %39, %48 : vector<2x128xi1>, vector<2x128xf32>
      %50 = vector.broadcast %33 : vector<1x128xf32> to vector<2x128xf32>
      %51 = arith.mulf %44, %50 : vector<2x128xf32>
      %cst_36 = arith.constant dense<0.000000e+00> : vector<2xf32>
      %52 = vector.multi_reduction <add>, %51, %cst_36 [1] : vector<2x128xf32> to vector<2xf32>
      %53 = vector.shape_cast %52 : vector<2xf32> to vector<2x1xf32>
      %c0_37 = arith.constant 0 : index
      %c0_38 = arith.constant 0 : index
      %54 = vector.load %arg9[%c0_37, %c0_38] : memref<2x1xf32, #tpu.memory_space<vmem>>, vector<2x1xf32>
      tpu.vector_store %arg9[%c0_37, %c0_38], %53 {strides = array<i32>} : memref<2x1xf32, #tpu.memory_space<vmem>>, vector<2x1xf32>,
      %55 = vector.broadcast %33 : vector<1x128xf32> to vector<2x128xf32>
      %56 = arith.mulf %49, %55 : vector<2x128xf32>
      %cst_39 = arith.constant dense<0.000000e+00> : vector<2xf32>
      %57 = vector.multi_reduction <add>, %56, %cst_39 [1] : vector<2x128xf32> to vector<2xf32>
      %58 = vector.shape_cast %57 : vector<2xf32> to vector<2x1xf32>
      %c0_40 = arith.constant 0 : index
      %c0_41 = arith.constant 0 : index
      %59 = vector.load %arg10[%c0_40, %c0_41] : memref<2x1xf32, #tpu.memory_space<vmem>>, vector<2x1xf32>
      tpu.vector_store %arg10[%c0_40, %c0_41], %58 {strides = array<i32>} : memref<2x1xf32, #tpu.memory_space<vmem>>, vector<2x1xf32>,
      %c0_42 = arith.constant 0 : index
      %c0_43 = arith.constant 0 : index
      %60 = vector.load %arg14[%c0_42, %c0_43] : memref<2x128xf32, #tpu.memory_space<vmem>>, vector<2x128xf32>
      %61 = vector.broadcast %32 : vector<1x128xf32> to vector<2x128xf32>
      %62 = arith.addf %60, %61 : vector<2x128xf32>
      %cst_44 = arith.constant 0.000000e+00 : f32
      %63 = vector.broadcast %cst_44 : f32 to vector<2x128xf32>
      %64 = arith.cmpf ogt, %62, %63 : vector<2x128xf32>
      %cst_45 = arith.constant 1.000000e+00 : f32
      %cst_46 = arith.constant 2.000000e-01 : f32
      %65 = vector.broadcast %cst_45 : f32 to vector<2x128xf32>
      %66 = vector.broadcast %cst_46 : f32 to vector<2x128xf32>
      %67 = arith.select %64, %65, %66 : vector<2x128xi1>, vector<2x128xf32>
      %68 = vector.broadcast %33 : vector<1x128xf32> to vector<2x128xf32>
      %69 = arith.mulf %67, %68 : vector<2x128xf32>
      %c0_47 = arith.constant 0 : index
      %c0_48 = arith.constant 0 : index
      %70 = vector.load %arg8[%c0_47, %c0_48] : memref<128x128xf32, #tpu.memory_space<vmem>>, vector<128x128xf32>
      %cst_49 = arith.constant dense<0.000000e+00> : vector<2x128xf32>
      %71 = tpu.matmul %69, %70, %cst_49 {dimension_numbers = #tpu.dot_dimension_numbers<[1], [0], [0], [1], [0, 0, 1, 1], [], []>} : vector<2x128xf32>, vector<128x128xf32>, vector<2x128xf32> -> vector<2x128xf32>
      %72 = arith.mulf %71, %69 : vector<2x128xf32>
      %cst_50 = arith.constant dense<0.000000e+00> : vector<2xf32>
      %73 = vector.multi_reduction <add>, %72, %cst_50 [1] : vector<2x128xf32> to vector<2xf32>
      %74 = vector.shape_cast %73 : vector<2xf32> to vector<2x1xf32>
      %c0_51 = arith.constant 0 : index
      %c0_52 = arith.constant 0 : index
      %75 = vector.load %arg11[%c0_51, %c0_52] : memref<2x1xf32, #tpu.memory_space<vmem>>, vector<2x1xf32>
      tpu.vector_store %arg11[%c0_51, %c0_52], %74 {strides = array<i32>} : memref<2x1xf32, #tpu.memory_space<vmem>>, vector<2x1xf32>,
    } else {
    }
    return
  }
  func.func @transform_0(%arg0: i32, %arg1: i32) -> (i32, i32) {
    %c0_i32 = arith.constant 0 : i32
    return %arg0, %arg1 : i32, i32
  }
  func.func @transform_1(%arg0: i32, %arg1: i32) -> (i32, i32) {
    %c0_i32 = arith.constant 0 : i32
    return %arg0, %arg1 : i32, i32
  }
  func.func @transform_2(%arg0: i32, %arg1: i32) -> (i32, i32) {
    %c0_i32 = arith.constant 0 : i32
    %c0_i32_0 = arith.constant 0 : i32
    return %arg0, %c0_i32 : i32, i32
  }
  func.func @transform_3(%arg0: i32, %arg1: i32) -> (i32, i32) {
    %c0_i32 = arith.constant 0 : i32
    %c0_i32_0 = arith.constant 0 : i32
    return %arg1, %c0_i32 : i32, i32
  }
  func.func @transform_4(%arg0: i32, %arg1: i32) -> (i32, i32) {
    %c0_i32 = arith.constant 0 : i32
    %c0_i32_0 = arith.constant 0 : i32
    %c0_i32_1 = arith.constant 0 : i32
    return %c0_i32, %c0_i32_0 : i32, i32
  }
  func.func @transform_5(%arg0: i32, %arg1: i32) -> (i32, i32) {
    %c0_i32 = arith.constant 0 : i32
    %c0_i32_0 = arith.constant 0 : i32
    %c0_i32_1 = arith.constant 0 : i32
    return %c0_i32, %c0_i32_0 : i32, i32
  }
  func.func @transform_6(%arg0: i32, %arg1: i32) -> (i32, i32) {
    %c0_i32 = arith.constant 0 : i32
    %c0_i32_0 = arith.constant 0 : i32
    %c0_i32_1 = arith.constant 0 : i32
    return %c0_i32, %c0_i32_0 : i32, i32
  }
  func.func @transform_7(%arg0: i32, %arg1: i32) -> (i32, i32) {
    %c0_i32 = arith.constant 0 : i32
    %c0_i32_0 = arith.constant 0 : i32
    return %arg0, %c0_i32 : i32, i32
  }
  func.func @transform_8(%arg0: i32, %arg1: i32) -> (i32, i32) {
    %c0_i32 = arith.constant 0 : i32
    %c0_i32_0 = arith.constant 0 : i32
    return %arg0, %c0_i32 : i32, i32
  }
  func.func @transform_9(%arg0: i32, %arg1: i32) -> (i32, i32) {
    %c0_i32 = arith.constant 0 : i32
    %c0_i32_0 = arith.constant 0 : i32
    return %arg0, %c0_i32 : i32, i32
  }
}

</mosaic_0001>

<bundles_post_ra>
// kernel: squeeze.2
= control target key start
LH: loop header
LB: loop body
LE: loop exit
PB: predicated region body
PF: predicated region fallthrough
CT: control target
= control target key end

     0   :  { %s641_s10 = smov 3  ;;  %s646_s13 = smov 12  ;;  %vm213_vm0 = vcmask 1043458   ;;  %vm218_vm1 = vcmask 1045508   ;;  %vm223_vm2 = vcmask 1047558   ;;  %vm195_vm3 = vcmask 1047556   ;;  %s745_s0 = inlined_call_operand.vmem [shape: bf16[2,1,3,16,16], index: 0, kind: input, shape index: {}]   ;;  %s746_s1 = inlined_call_operand.vmem [shape: bf16[2,768], index: 1, kind: output, shape index: {}]  }
   0x1   :  { %v604_v0 = vld [vmem:[%s745_s0 + $0x28] sm:$0xff]   ;;  %v607_v1 = vld [vmem:[%s745_s0 + $0x10] sm:$0xff]   ;;  %v605_v2 = vld [vmem:[%s745_s0 + $0x20] sm:$0xff]   ;;  %s659_s20 = smov 12  ;;  %s661_s21 = smov 3  ;;  %vm197_vm4 = vcmask 130048  }
   0x2   :  { %v582_v3 = vunpack.c.l.bf16 %v604_v0  ;;  %v583_v4 = vunpack.c.h.bf16 %v604_v0  ;;  %v594_v5 = vunpack.c.l.bf16 %v607_v1  ;;  %v595_v6 = vunpack.c.h.bf16 %v607_v1  ;;  %v606_v7 = vld [vmem:[%s745_s0 + $0x18] sm:$0xff]   ;;  %v608_v8 = vld [vmem:[%s745_s0 + $0x8] sm:$0xff]   ;;  %v601_v9 = vld [vmem:[%s745_s0] sm:$0xff]   ;;  %s657_s0 = smov 3  ;;  %s325_s22 = smov 12 }
   0x3   :  { %v586_v10 = vunpack.c.l.bf16 %v605_v2  ;;  %v587_v11 = vunpack.c.h.bf16 %v605_v2  ;;  %v590_v12 = vunpack.c.l.bf16 %v606_v7  ;;  %v591_v13 = vunpack.c.h.bf16 %v606_v7  ;;  %s208_s23 = smov 3  ;;  %s211_s24 = smov 12 }
   0x4   :  { %20 = vst [vmem:[#allocation1 + $0x58] sm:$0xff] %v583_v4  ;;  %36 = vst [vmem:[#allocation1 + $0x50] sm:$0xff] %v582_v3  ;;  %v598_v14 = vunpack.c.l.bf16 %v608_v8  ;;  %v599_v15 = vunpack.c.h.bf16 %v608_v8  ;;  %v602_v16 = vunpack.c.l.bf16 %v601_v9  ;;  %v603_v17 = vunpack.c.h.bf16 %v601_v9  ;;  %s216_s25 = smov 48  ;;  %s221_s26 = smov 192 }
   0x5   :  { %116 = vst [vmem:[#allocation1 + $0x28] sm:$0xff] %v595_v6  ;;  %132 = vst [vmem:[#allocation1 + $0x20] sm:$0xff] %v594_v5  ;;  %s365_s27 = smov 3  ;;  %s368_s28 = smov 12  ;;  %vm227_vm5 = vcmask 1048448   ;;  %vm270_vm6 = vcmask 917248  }
   0x6   :  { %52 = vst [vmem:[#allocation1 + $0x48] sm:$0xff] %v587_v11  ;;  %68 = vst [vmem:[#allocation1 + $0x40] sm:$0xff] %v586_v10  ;;  %s294_s29 = smov 3  ;;  %s297_s30 = smov 12  ;;  %vm313_vm7 = vcmask 786048   ;;  %vm356_vm8 = vcmask 654848  }
   0x7   :  { %84 = vst [vmem:[#allocation1 + $0x38] sm:$0xff] %v591_v13  ;;  %100 = vst [vmem:[#allocation1 + $0x30] sm:$0xff] %v590_v12  ;;  %s302_s2 = smov 48  ;;  %s307_s3 = smov 192  ;;  %vm399_vm9 = vcmask 523648   ;;  %vm442_vm10 = vcmask 392448  }
   0x8   :  { %148 = vst [vmem:[#allocation1 + $0x18] sm:$0xff] %v599_v15  ;;  %164 = vst [vmem:[#allocation1 + $0x10] sm:$0xff] %v598_v14  ;;  %s617_s4 = smov 96   ;;  %s618_s5 = smov 112   ;;  %vm485_vm11 = vcmask 261248  }
   0x9   :  { %179 = vst [vmem:[#allocation1 + $0x8] sm:$0xff] %v603_v17  ;;  %192 = vst [vmem:[#allocation1] sm:$0xff] %v602_v16  ;;  %s251_s6 = smov 3  ;;  %s254_s7 = smov 12 }
   0xa   :  { %s619_s8 = smov 80   ;;  %s259_s9 = smov 48 }
   0xb   :  { %s337_s11 = smov 3  ;;  %s340_s12 = smov 12 }
   0xc   :  { %v280_v18 = vld [vmem:[#allocation1 + $0x26] ss:$48 sm:%s641_s10]   ;;  %v283_v19 = vld [vmem:[#allocation1 - $0x32] ss:$48 sm:%s646_s13]   ;;  %v237_v20 = vld [vmem:[#allocation1 + $0x27] ss:$48 sm:%s657_s0]  }
   0xd   :  { %v285_v21 = vsel %vm213_vm0, %v283_v19, %v280_v18  ;;  %v240_v22 = vld [vmem:[#allocation1 - $0x31] ss:$48 sm:%s659_s20]   ;;  %v323_v23 = vld [vmem:[#allocation1 + $0x25] ss:$48 sm:%s661_s21]   ;;  %v326_v24 = vld [vmem:[#allocation1 - $0x33] ss:$48 sm:%s325_s22]  }
   0xe   :  { %286 = vrot.lane.b32.xlu1 %v285_v21, %s617_s4  ;;  %v242_v25 = vsel %vm213_vm0, %v240_v22, %v237_v20  ;;  %v328_v29 = vsel %vm213_vm0, %v326_v24, %v323_v23  ;;  %v366_v32 = vld [vmem:[#allocation1 + $0x24] ss:$48 sm:%s365_s27]   ;;  %v369_v33 = vld [vmem:[#allocation1 - $0x34] ss:$48 sm:%s368_s28]   ;;  %s264_s10 = smov 192  ;;  %s345_s13 = smov 48 }
   0xf   :  { %v217_v28 = vld [vmem:[#allocation1 - $0xa9] ss:$48 sm:%s216_s25]   ;;  %243 = vrot.lane.b32.xlu0 %v242_v25, %s618_s5  ;;  %v222_v31 = vld [vmem:[#allocation1 - $0x101] ss:$48 sm:%s221_s26]   ;;  %v303_v37 = vld [vmem:[#allocation1 - $0xab] ss:$48 sm:%s302_s2]   ;;  %v371_v44 = vsel %vm213_vm0, %v369_v33, %v366_v32 }
  0x10   :  { %v209_v26 = vld [vmem:[#allocation1 + $0x7] ss:$48 sm:%s208_s23]   ;;  %v212_v27 = vld [vmem:[#allocation1 - $0x51] ss:$48 sm:%s211_s24]   ;;  %v295_v35 = vld [vmem:[#allocation1 + $0x5] ss:$48 sm:%s294_s29]  }
  0x11   :  { %v214_v30 = vsel %vm213_vm0, %v212_v27, %v209_v26  ;;  %v298_v36 = vld [vmem:[#allocation1 - $0x53] ss:$48 sm:%s297_s30]   ;;  %v252_v42 = vld [vmem:[#allocation1 + $0x6] ss:$48 sm:%s251_s6]   ;;  %v255_v43 = vld [vmem:[#allocation1 - $0x52] ss:$48 sm:%s254_s7]  }
  0x12   :  { %v219_v34 = vsel %vm218_vm1, %v217_v28, %v214_v30  ;;  %v300_v39 = vsel %vm213_vm0, %v298_v36, %v295_v35  ;;  %v308_v40 = vld [vmem:[#allocation1 - $0x103] ss:$48 sm:%s307_s3]   ;;  %329 = vrot.lane.b32.xlu1 %v328_v29, %s619_s8  ;;  %v257_v45 = vsel %vm213_vm0, %v255_v43, %v252_v42  ;;  %v260_v46 = vld [vmem:[#allocation1 - $0xaa] ss:$48 sm:%s259_s9]   ;;  %v265_v47 = vld [vmem:[#allocation1 - $0x102] ss:$48 sm:%s264_s10]  }
  0x13   :  { %v224_v38 = vsel %vm223_vm2, %v222_v31, %v219_v34  ;;  %v305_v41 = vsel %vm218_vm1, %v303_v37, %v300_v39  ;;  %v262_v49 = vsel %vm218_vm1, %v260_v46, %v257_v45  ;;  %v338_v50 = vld [vmem:[#allocation1 + $0x4] ss:$48 sm:%s337_s11]   ;;  %v341_v51 = vld [vmem:[#allocation1 - $0x54] ss:$48 sm:%s340_s12]   ;;  %s350_s14 = smov 192  ;;  %s408_s15 = smov 3 }
  0x14   :  { %225 = vrot.lane.b32.xlu0 %v224_v38, %s618_s5  ;;  %v310_v48 = vsel %vm223_vm2, %v308_v40, %v305_v41  ;;  %v343_v52 = vsel %vm213_vm0, %v341_v51, %v338_v50  ;;  %v346_v53 = vld [vmem:[#allocation1 - $0xac] ss:$48 sm:%s345_s13]   ;;  %v351_v54 = vld [vmem:[#allocation1 - $0x104] ss:$48 sm:%s350_s14]   ;;  %s620_s16 = smov 64   ;;  %s411_s17 = smov 12  ;;  %v267_v57 = vsel %vm223_vm2, %v265_v47, %v262_v49 }
  0x15   :  { %v348_v55 = vsel %vm218_vm1, %v346_v53, %v343_v52  ;;  %v409_v56 = vld [vmem:[#allocation1 + $0x23] ss:$48 sm:%s408_s15]   ;;  %s380_s18 = smov 3  ;;  %v412_v58 = vld [vmem:[#allocation1 - $0x35] ss:$48 sm:%s411_s17]   ;;  %s383_s19 = smov 12 }
  0x16   :  { %372 = vrot.lane.b32.xlu1 %v371_v44, %s620_s16  ;;  %v381_v59 = vld [vmem:[#allocation1 + $0x3] ss:$48 sm:%s380_s18]   ;;  %s388_s0 = smov 48  ;;  %v353_v60 = vsel %vm223_vm2, %v351_v54, %v348_v55  ;;  %v384_v61 = vld [vmem:[#allocation1 - $0x55] ss:$48 sm:%s383_s19]   ;;  %s393_s20 = smov 192  ;;  %v414_v3 = vsel %vm213_vm0, %v412_v58, %v409_v56 }
  0x17   :  { %v389_v62 = vld [vmem:[#allocation1 - $0xad] ss:$48 sm:%s388_s0]   ;;  %v386_v63 = vsel %vm213_vm0, %v384_v61, %v381_v59  ;;  %v394_v0 = vld [vmem:[#allocation1 - $0x105] ss:$48 sm:%s393_s20]   ;;  %s451_s21 = smov 3  ;;  %s454_s22 = smov 12 }
  0x18   :  { %311 = vrot.lane.b32.xlu0 %v310_v48, %s619_s8  ;;  %v391_v1 = vsel %vm218_vm1, %v389_v62, %v386_v63  ;;  %v452_v2 = vld [vmem:[#allocation1 + $0x22] ss:$48 sm:%s451_s21]   ;;  %s423_s23 = smov 3  ;;  %s426_s24 = smov 12  ;;  %v455_v7 = vld [vmem:[#allocation1 - $0x36] ss:$48 sm:%s454_s22]  }
  0x19   :  { %v424_v4 = vld [vmem:[#allocation1 + $0x2] ss:$48 sm:%s423_s23]   ;;  %v427_v5 = vld [vmem:[#allocation1 - $0x56] ss:$48 sm:%s426_s24]   ;;  %s431_s25 = smov 48  ;;  %s436_s26 = smov 192  ;;  %v396_v6 = vsel %vm223_vm2, %v394_v0, %v391_v1  ;;  %v457_v15 = vsel %vm213_vm0, %v455_v7, %v452_v2 }
  0x1a   :  { %268 = vrot.lane.b32.xlu1 %v267_v57, %s617_s4  ;;  %v429_v8 = vsel %vm213_vm0, %v427_v5, %v424_v4  ;;  %v432_v9 = vld [vmem:[#allocation1 - $0xae] ss:$48 sm:%s431_s25]   ;;  %s494_s27 = smov 3  ;;  %v437_v11 = vld [vmem:[#allocation1 - $0x106] ss:$48 sm:%s436_s26]   ;;  %s497_s28 = smov 12 }
  0x1b   :  { %v434_v10 = vsel %vm218_vm1, %v432_v9, %v429_v8  ;;  %s466_s29 = smov 3  ;;  %s621_s30 = smov 48   ;;  %v495_v12 = vld [vmem:[#allocation1 + $0x21] ss:$48 sm:%s494_s27]   ;;  %v498_v13 = vld [vmem:[#allocation1 - $0x37] ss:$48 sm:%s497_s28]  }
  0x1c   :  { %354 = vrot.lane.b32.xlu0 %v353_v60, %s620_s16  ;;  %v467_v14 = vld [vmem:[#allocation1 + $0x1] ss:$48 sm:%s466_s29]   ;;  %s469_s2 = smov 12  ;;  %s474_s3 = smov 48  ;;  %v439_v18 = vsel %vm223_vm2, %v437_v11, %v434_v10  ;;  %v500_v26 = vsel %vm213_vm0, %v498_v13, %v495_v12  ;;  %v624_v44 = vmov 0.0  }
  0x1d   :  { %v470_v16 = vld [vmem:[#allocation1 - $0x57] ss:$48 sm:%s469_s2]   ;;  %v475_v17 = vld [vmem:[#allocation1 - $0xaf] ss:$48 sm:%s474_s3]   ;;  %s479_s4 = smov 192  ;;  %s622_s5 = smov 32  }
  0x1e   :  { %415 = vrot.lane.b32.xlu1 %v414_v3, %s621_s30  ;;  %v472_v19 = vsel %vm213_vm0, %v470_v16, %v467_v14  ;;  %v480_v20 = vld [vmem:[#allocation1 - $0x107] ss:$48 sm:%s479_s4]   ;;  %v193_v21 = vld [vmem:[#allocation1] ss:$8 sm:$0xf]   ;;  %s623_s6 = smov 16  }
  0x1f   :  { %v477_v22 = vsel %vm218_vm1, %v475_v17, %v472_v19  ;;  %v194_v23 = vld [vmem:[#allocation1] ss:$8 sm:$0xf0]  }
  0x20   :  { %397 = vrot.lane.b32.xlu0 %v396_v6, %s621_s30  ;;  %v203_v24 = vld [vmem:[#allocation1 + $0x40] ss:$8 sm:$0xf]   ;;  %v196_v25 = vsel %vm195_vm3, %v194_v23, %v193_v21  ;;  %v482_v27 = vsel %vm223_vm2, %v480_v20, %v477_v22 }
  0x21   :  { %206 = vst.msk [vmem:[#allocation0 + $0x11] ss:$8 sm:$0xf] %vm197_vm4, %v203_v24   ;;  %199 = vst.msk [vmem:[#allocation0] ss:$8 sm:$0x30] %vm197_vm4, %v196_v25  }
  0x22   :  { %458 = vrot.lane.b32.xlu1 %v457_v15, %s622_s5  ;;  %198 = vst.msk [vmem:[#allocation0] ss:$8 sm:$0xf] %vm197_vm4, %v196_v25   ;;  %201 = vst.msk [vmem:[#allocation0 - $0x2f] ss:$8 sm:$0xc0] %vm197_vm4, %v196_v25  }
  0x24   :  { %440 = vrot.lane.b32.xlu0 %v439_v18, %s622_s5 }
  0x26   :  { %501 = vrot.lane.b32.xlu1 %v500_v26, %s623_s6 }
  0x28   :  { %483 = vrot.lane.b32.xlu0 %v482_v27, %s623_s6 }
  0x80   :  { %v287_v28 = vpop.permute.xlu1 %286  }
  0x81   :  { %v244_v29 = vpop.permute.xlu0 %243  }
  0x82   :  { %247 = vst.msk [vmem:[#allocation0 + $0x20] sm:$0x3] %vm227_vm5, %v244_v29   ;;  %249 = vst.msk [vmem:[#allocation0 + $0x26] sm:$0xc] %vm227_vm5, %v244_v29  }
  0x83   :  { %290 = vst.msk [vmem:[#allocation0 + $0x20] sm:$0x3] %vm270_vm6, %v287_v28   ;;  %292 = vst.msk [vmem:[#allocation0 + $0x26] sm:$0xc] %vm270_vm6, %v287_v28  }
  0x84   :  { %v330_v30 = vpop.permute.xlu1 %329  }
  0x85   :  { %333 = vst.msk [vmem:[#allocation0 + $0x20] sm:$0x3] %vm313_vm7, %v330_v30   ;;  %335 = vst.msk [vmem:[#allocation0 + $0x26] sm:$0xc] %vm313_vm7, %v330_v30  }
  0x86   :  { %v226_v31 = vpop.permute.xlu0 %225  }
  0x87   :  { %228 = vst.msk [vmem:[#allocation0] sm:$0x3] %vm227_vm5, %v226_v31   ;;  %230 = vst.msk [vmem:[#allocation0 + $0x6] sm:$0xc] %vm227_vm5, %v226_v31  }
  0x88   :  { %232 = vst.msk [vmem:[#allocation0 + $0xc] sm:$0x30] %vm227_vm5, %v226_v31   ;;  %234 = vst.msk [vmem:[#allocation0 + $0x12] sm:$0xc0] %vm227_vm5, %v226_v31   ;;  %v373_v32 = vpop.permute.xlu1 %372  }
  0x89   :  { %376 = vst.msk [vmem:[#allocation0 + $0x20] sm:$0x3] %vm356_vm8, %v373_v32   ;;  %378 = vst.msk [vmem:[#allocation0 + $0x26] sm:$0xc] %vm356_vm8, %v373_v32  }
  0x8a   :  { %v312_v33 = vpop.permute.xlu0 %311  }
  0x8c   :  { %v269_v34 = vpop.permute.xlu1 %268  }
  0x8d   :  { %271 = vst.msk [vmem:[#allocation0] sm:$0x3] %vm270_vm6, %v269_v34   ;;  %273 = vst.msk [vmem:[#allocation0 + $0x6] sm:$0xc] %vm270_vm6, %v269_v34  }
  0x8e   :  { %275 = vst.msk [vmem:[#allocation0 + $0xc] sm:$0x30] %vm270_vm6, %v269_v34   ;;  %277 = vst.msk [vmem:[#allocation0 + $0x12] sm:$0xc0] %vm270_vm6, %v269_v34   ;;  %v355_v35 = vpop.permute.xlu0 %354  }
  0x8f   :  { %314 = vst.msk [vmem:[#allocation0] sm:$0x3] %vm313_vm7, %v312_v33   ;;  %316 = vst.msk [vmem:[#allocation0 + $0x6] sm:$0xc] %vm313_vm7, %v312_v33  }
  0x90   :  { %318 = vst.msk [vmem:[#allocation0 + $0xc] sm:$0x30] %vm313_vm7, %v312_v33   ;;  %320 = vst.msk [vmem:[#allocation0 + $0x12] sm:$0xc0] %vm313_vm7, %v312_v33   ;;  %v416_v36 = vpop.permute.xlu1 %415  }
  0x91   :  { %357 = vst.msk [vmem:[#allocation0] sm:$0x3] %vm356_vm8, %v355_v35   ;;  %359 = vst.msk [vmem:[#allocation0 + $0x6] sm:$0xc] %vm356_vm8, %v355_v35  }
  0x92   :  { %361 = vst.msk [vmem:[#allocation0 + $0xc] sm:$0x30] %vm356_vm8, %v355_v35   ;;  %363 = vst.msk [vmem:[#allocation0 + $0x12] sm:$0xc0] %vm356_vm8, %v355_v35   ;;  %v398_v37 = vpop.permute.xlu0 %397  }
  0x93   :  { %419 = vst.msk [vmem:[#allocation0 + $0x20] sm:$0x3] %vm399_vm9, %v416_v36   ;;  %421 = vst.msk [vmem:[#allocation0 + $0x26] sm:$0xc] %vm399_vm9, %v416_v36  }
  0x94   :  { %400 = vst.msk [vmem:[#allocation0] sm:$0x3] %vm399_vm9, %v398_v37   ;;  %402 = vst.msk [vmem:[#allocation0 + $0x6] sm:$0xc] %vm399_vm9, %v398_v37   ;;  %v459_v38 = vpop.permute.xlu1 %458  }
  0x95   :  { %404 = vst.msk [vmem:[#allocation0 + $0xc] sm:$0x30] %vm399_vm9, %v398_v37   ;;  %406 = vst.msk [vmem:[#allocation0 + $0x12] sm:$0xc0] %vm399_vm9, %v398_v37  }
  0x96   :  { %462 = vst.msk [vmem:[#allocation0 + $0x20] sm:$0x3] %vm442_vm10, %v459_v38   ;;  %464 = vst.msk [vmem:[#allocation0 + $0x26] sm:$0xc] %vm442_vm10, %v459_v38   ;;  %v441_v39 = vpop.permute.xlu0 %440  }
  0x97   :  { %443 = vst.msk [vmem:[#allocation0] sm:$0x3] %vm442_vm10, %v441_v39   ;;  %445 = vst.msk [vmem:[#allocation0 + $0x6] sm:$0xc] %vm442_vm10, %v441_v39  }
  0x98   :  { %447 = vst.msk [vmem:[#allocation0 + $0xc] sm:$0x30] %vm442_vm10, %v441_v39   ;;  %449 = vst.msk [vmem:[#allocation0 + $0x12] sm:$0xc0] %vm442_vm10, %v441_v39   ;;  %v502_v40 = vpop.permute.xlu1 %501  }
  0x99   :  { %505 = vst.msk [vmem:[#allocation0 + $0x20] sm:$0x3] %vm485_vm11, %v502_v40   ;;  %507 = vst.msk [vmem:[#allocation0 + $0x26] sm:$0xc] %vm485_vm11, %v502_v40  }
  0x9a   :  { %v484_v41 = vpop.permute.xlu0 %483  }
  0x9b   :  { %486 = vst.msk [vmem:[#allocation0] sm:$0x3] %vm485_vm11, %v484_v41   ;;  %488 = vst.msk [vmem:[#allocation0 + $0x6] sm:$0xc] %vm485_vm11, %v484_v41  }
  0x9c   :  { %490 = vst.msk [vmem:[#allocation0 + $0xc] sm:$0x30] %vm485_vm11, %v484_v41   ;;  %492 = vst.msk [vmem:[#allocation0 + $0x12] sm:$0xc0] %vm485_vm11, %v484_v41  }
  0xa0   :  { %v537_v42 = vld [vmem:[#allocation0 + $0x20] sm:$0x3]  ;;  %v544_v43 = vld [vmem:[#allocation0 + $0x28] sm:$0x3] }
  0xa1   :  { %v538_v45 = vpack.c.bf16 %v624_v44, %v537_v42  ;;  %v545_v46 = vpack.c.bf16 %v624_v44, %v544_v43 }
  0xa2   :  { %v512_v47 = vld [vmem:[#allocation0] sm:$0x3]  ;;  %v517_v48 = vld [vmem:[#allocation0 + $0x8] sm:$0x3] }
  0xa3   :  { %v523_v49 = vld [vmem:[#allocation0 + $0x10] sm:$0x3]  ;;  %v513_v50 = vpack.c.bf16 %v624_v44, %v512_v47  ;;  %v518_v51 = vpack.c.bf16 %v624_v44, %v517_v48  ;;  %v530_v53 = vld [vmem:[#allocation0 + $0x18] sm:$0x3]  ;;  %578 = vst [vmem:[%s746_s1 + $0x4] sm:$0x1] %v538_v45 }
  0xa4   :  { %v524_v52 = vpack.c.bf16 %v624_v44, %v523_v49  ;;  %579 = vst [vmem:[%s746_s1 + $0x5] sm:$0x1] %v545_v46  ;;  %v531_v54 = vpack.c.bf16 %v624_v44, %v530_v53 }
  0xa5   :  { %515 = vst [vmem:[%s746_s1] sm:$0x1] %v513_v50  ;;  %575 = vst [vmem:[%s746_s1 + $0x1] sm:$0x1] %v518_v51 }
  0xa6   :  { %576 = vst [vmem:[%s746_s1 + $0x2] sm:$0x1] %v524_v52  ;;  %577 = vst [vmem:[%s746_s1 + $0x3] sm:$0x1] %v531_v54 }

// kernel: _lambda_.1
= control target key start
LH: loop header
LB: loop body
LE: loop exit
PB: predicated region body
PF: predicated region fallthrough
CT: control target
= control target key end

     0   :  { %15 = vsyncpa [#allocation6], 0  ;;  %s2346_s0 = inlined_call_operand.vmem [shape: bf16[2,1024], index: 0, kind: input, shape index: {}]   ;;  %s2347_s1 = inlined_call_operand.vmem [shape: bf16[2,1024], index: 1, kind: input, shape index: {}]   ;;  %s2348_s2 = inlined_call_operand.vmem [shape: f32[2,1], index: 2, kind: input, shape index: {}]   ;;  %s2349_s3 = inlined_call_operand.hbm [shape: bf16[1024,128], index: 3, kind: input, shape index: {}]   ;;  %s2350_s4 = inlined_call_operand.vmem [shape: f32[1,128], index: 4, kind: input, shape index: {}]   ;;  %s2351_s5 = inlined_call_operand.vmem [shape: f32[1,128], index: 5, kind: input, shape index: {}]   ;;  %s2352_s6 = inlined_call_operand.vmem [shape: f32[128,128], index: 6, kind: input, shape index: {}]   ;;  %s2353_s7 = inlined_call_operand.vmem [shape: f32[2,1], index: 7, kind: output, shape index: {0}]   ;;  %s2354_s8 = inlined_call_operand.vmem [shape: f32[2,1], index: 8, kind: output, shape index: {1}]   ;;  %s2355_s9 = inlined_call_operand.vmem [shape: f32[2,1], index: 9, kind: output, shape index: {2}]  }
   0x1   :  { %17 = vsyncpa [#allocation6 + $0x1], 0  ;;  %s1924_s30 = smov 0   ;;  %s1926_s10 = smov 0  }
   0x2   :  { %s1928_s11 = smov 0   ;;  %s1930_s12 = smov 0  }
   0x3   :  { %s1932_s13 = smov 0   ;;  %s1934_s14 = smov 0  }
   0x4 LB: > { %s1422_s15 = sadd.s32 4294967295, %s1861_s14   ;;  %s32_s16 = sadd.s32 1, %s1857_s13  ;;  %s1861_s14 = sphi %s1934_s14, %s23_s14   ;;  %s1857_s13 = sphi %s1932_s13, %s2363_s13   ;;  %s1853_s12 = sphi %s1930_s12, %s2362_s12   ;;  %s1849_s11 = sphi %s1928_s11, %s2361_s11   ;;  %s1845_s10 = sphi %s1926_s10, %s2360_s10   ;;  %s1841_s30 = sphi %s1924_s30, %s2359_s30  }
   0x5   : > { %p33_p0 = scmp.ge.s32.totalorder %s32_s16, 2  ;;  %s124_s17 = sadd.s32 1, %s1849_s11 }
   0x6   : > { %p131_p1 = scmp.ne.s32.totalorder %s1849_s11, %s1845_s10  ;;  %p132_p2 = scmp.eq.s32.totalorder %s1861_s14, 0 }
   0x7   : > { %s2365_s16 = smov (%p33_p0, %s32_s16), 0  ;;  %p137_p4 = scmp.ne.s32.totalorder %s1845_s10, %s1841_s30 }
   0x8   : > { %p1960_p3 = por %p132_p2, %p131_p1  ;;  %s121_s19 = ssub.s32 %s1857_s13, %s2365_s16 }
   0x9   : > { %p138_p5 = scmp.eq.s32.totalorder %s1422_s15, 0  ;;  %p122_p6 = scmp.eq.s32.totalorder %s121_s19, 0 }
   0xa   : > { %p1689_p8 = scmp.lt.s32.totalorder %s1861_s14, 2  ;;  %s342_s22 = sand.u32 1, %s1849_s11  }
   0xb   : > { %p1967_p7 = por %p138_p5, %p137_p4  ;;  %s1474_s23 = sshll.u32 %s1857_s13, 12 }
   0xc   : > { %s1973_s21 = scalar_select %p122_p6, %s1849_s11, %s124_s17  }
   0xd   : > { %s1426_s24 = sshll.u32 %s342_s22, 8  ;;  %s1980_s27 = scalar_lea.hbm %s2349_s3, %s1474_s23 }
   0xe   : > { %s346_s28 = scalar_lea.vmem [#allocation5], %s1426_s24  ;;  %p1984_p9 = pnand %p1689_p8, %p1960_p3 }
   0xf   : > { %s353_s29 = sshll.u32 %s346_s28, 4  ;;  %s1990_s15 = scalar_lea.sflag [#allocation6], %s342_s22  ;;  %s1988_s29 = int_to_ptr.vmem [resolvable:$true] %s353_s29 }
  0x10   : > { %s1781_s17 = scalar_lea.hbm %s1980_s27, 4096  ;;  %p1783_p11 = pneg %p1984_p9 }
  0x11   : > { %p1782_p10 = scmp.ne.s32.totalorder %s1980_s27, %s1781_s17  ;;  %s1786_s23 = scalar_lea.hbm %s2349_s3, 8192 }
  0x12   : > { %p1787_p0 = scmp.lt.u32.totalorder %s1980_s27, %s2349_s3  ;;  %p1788_p1 = scmp.lt.u32.totalorder %s1786_s23, %s1781_s17 }
  0x13   : > { %p1784_p12 = pnand %p1783_p11, %p1782_p10  ;;  %p1790_p3 = scmp.lt.u32.totalorder %s1781_s17, %s1980_s27 }
  0x14   : > { %p1789_p2 = por %p1788_p1, %p1787_p0 }
  0x15   : > { %p1785_p13 = pneg %p1784_p12 }
  0x16   : > { %p1791_p4 = por %p1790_p3, %p1789_p2 }
  0x18   : > { %p1792_p5 = pnand %p1791_p4, %p1785_p13 }
  0x1a   : > { %1795 = shalt.err (!%p1792_p5)
}
  0x1b   : > { %s1796_s22 = scalar_lea.vmem %s1988_s29, 4096  ;;  %s1863_s26 = smov [#allocation5]  }
  0x1c   : > { %p1797_p6 = scmp.ne.s32.totalorder %s1988_s29, %s1796_s22  ;;  %s1801_s28 = sshll.u32 %s1863_s26, 4  ;;  %s1802_s28 = int_to_ptr.vmem [resolvable:$false] %s1801_s28 }
  0x1d   : > { %s1803_s19 = scalar_lea.vmem %s1802_s28, 8192  ;;  %p1804_p12 = scmp.lt.s32.totalorder %s1988_s29, %s1802_s28 }
  0x1e   : > { %p1799_p8 = pnand %p1797_p6, %p1783_p11  ;;  %p1805_p0 = scmp.lt.s32.totalorder %s1803_s19, %s1796_s22 }
  0x20   : > { %p1800_p10 = pneg %p1799_p8  ;;  %p1806_p1 = por %p1805_p0, %p1804_p12 }
  0x22   : > { %p1807_p2 = pnand %p1806_p1, %p1800_p10 }
  0x24   : > { %1810 = shalt.err (!%p1807_p2)
}
  0x25   : > { %s1864_s17 = smov 64   ;;  %s1865_s18 = smov 4  }
  0x26   : > { %1688 = dma.hbm_to_vmem [thread:$0]  (!%p1984_p9), %s1980_s27, 4096, %s1988_s29, %s1990_s15, %s1864_s17, %s1864_s17, %s1865_s18  }
  0x27   : > { %p1429_p11 = scmp.ge.s32.totalorder %s1861_s14, 1  ;;  %p361_p13 = scmp.lt.s32.totalorder %s1861_s14, 3 }
  0x29   : > { %p362_p3 = pnand %p1429_p11, %p361_p13 }
  0x2a   : > { %s367_s23 = sand.u32 (!%p362_p3), 1, %s1845_s10  }
  0x2b   : > { %365 = sbr.rel (%p362_p3) target bundleno = 792 (0x318), region = 48  ;;  %s1430_s24 = sshll.u32 (!%p362_p3), %s367_s23, 8 }
  0x2c   : > { %s368_s25 = scalar_lea.sflag (!%p362_p3), [#allocation6], %s367_s23  ;;  %s2021_s22 = scalar_lea.vmem (!%p362_p3), [#allocation5], %s1430_s24 }
  0x32   : > { %1836 = dma.done.wait (%p1967_p7), %s368_s25, 4096  }
  0x33   : > { %1838 = vsyncadd (%p1967_p7), %s368_s25, 4294963200  ;;  %s1431_s26 = sshll.u32 %s1853_s12, 2  ;;  %p1433_p9 = scmp.ne.s32.totalorder %s1853_s12, 0 }
  0x34   : > { %p436_p4 = scmp.lt.s32.totalorder %s1431_s26, 7  ;;  %v1866_v0 = vmov (!%p1433_p9), 0.0  }
  0x35   : > { %472 = sbr.rel (%p1433_p9) target bundleno = 60 (0x3c), region = 56  ;;  %473 = vst [vmem:[#allocation2] sm:$0x3] (!%p1433_p9), %v1866_v0  ;;  %474 = vst [vmem:[#allocation3] sm:$0x3] (!%p1433_p9), %v1866_v0 }
  0x36   : > { %s2367_s26 = smov (!%p436_p4, %s1431_s26), 7  ;;  %475 = vst [vmem:[#allocation4] sm:$0x3] (!%p1433_p9), %v1866_v0 }
  0x37   : > { %s440_s30 = scalar_lea.vmem %s2346_s0, %s2367_s26  ;;  %s449_s19 = scalar_lea.vmem %s2347_s1, %s2367_s26 }
  0x3c PF: > { %v542_v1 = vld [vmem:[%s2348_s2] sm:$0x3]  ;;  %v2043_v2 = vld [vmem:[%s2021_s22 + $0x40] sm:$0xff]   ;;  %v1867_v3 = vmov 0   ;;  %v2058_v8 = vld [vmem:[%s2021_s22 + $0x48] sm:$0xff]   ;;  %v548_v33 = vlaneseq  ;;  %p1466_p7 = scmp.ne.s32.totalorder %s1853_s12, 1 }
  0x3d   : > { %1748 = vset.pattern.permute.xlu0 %v1867_v3  ;;  %v991_v4 = vsub.f32 1.0, %v542_v1  ;;  %v2046_v5 = vld [vmem:[%s2021_s22 + $0xc0] sm:$0xff]   ;;  %1475 = vmatprep.subr.bf16.mxu0 %v2043_v2  ;;  %v2062_v9 = vld [vmem:[%s2021_s22 + $0xc8] sm:$0xff]   ;;  %v2074_v12 = vld [vmem:[%s2021_s22 + $0x50] sm:$0xff]   ;;  %v1868_v38 = vmov 1966171168  }
  0x3e   : > { %962 = vperm.xlu0 %1748, %v542_v1   ;;  %1497 = vmatprep.subr.bf16.mxu1 %v2046_v5  ;;  %v2051_v6 = vld [vmem:[%s2021_s22] sm:$0xff]   ;;  %v2066_v10 = vld [vmem:[%s2021_s22 + $0x8] sm:$0xff]   ;;  %v2078_v13 = vld [vmem:[%s2021_s22 + $0xd0] sm:$0xff]   ;;  %v546_v39 = vunpack.c.l.s4 %v1868_v38  ;;  %v549_v40 = vshrl.u32 %v548_v33, 7  ;;  %v1869_v43 = vmov 1983009808  }
  0x3f   : > { %v2054_v7 = vld [vmem:[%s2021_s22 + $0x80] sm:$0xff]   ;;  %1476 = vmatpush3.bf16.msra.mxu0 %v2051_v6  ;;  %v2070_v11 = vld [vmem:[%s2021_s22 + $0x88] sm:$0xff]   ;;  %v2082_v14 = vld [vmem:[%s2021_s22 + $0x10] sm:$0xff]   ;;  %v968_v44 = vunpack.c.l.s4 %v1869_v43  ;;  %vm1871_vm0 = vmmov (!%p1466_p7), 0   ;;  %vm1144_vm3 = vcmask (!%p1466_p7), 1041408   ;;  %vm1148_vm5 = vcmask (!%p1466_p7), 1024  }
  0x40   : > { %1498 = vmatpush3.bf16.msra.mxu1 %v2054_v7  ;;  %1477 = vmatprep.subr.bf16.mxu0 %v2058_v8  ;;  %v2086_v15 = vld [vmem:[%s2021_s22 + $0x90] sm:$0xff]   ;;  %v2090_v16 = vld [vmem:[%s2021_s22 + $0x58] sm:$0xff]   ;;  %v2106_v20 = vld [vmem:[%s2021_s22 + $0x60] sm:$0xff]   ;;  %v547_v46 = vunpack.c.0.s8 %v546_v39 }
  0x41   : > { %1499 = vmatprep.subr.bf16.mxu1 %v2062_v9  ;;  %v2094_v17 = vld [vmem:[%s2021_s22 + $0xd8] sm:$0xff]   ;;  %v2110_v21 = vld [vmem:[%s2021_s22 + $0xe0] sm:$0xff]   ;;  %v2122_v24 = vld [vmem:[%s2021_s22 + $0x68] sm:$0xff]   ;;  %v969_v47 = vunpack.c.0.s8 %v968_v44 }
  0x42   : > { %995 = vperm.xlu0 %1748, %v991_v4   ;;  %v2098_v18 = vld [vmem:[%s2021_s22 + $0x18] sm:$0xff]   ;;  %v2114_v22 = vld [vmem:[%s2021_s22 + $0x20] sm:$0xff]   ;;  %v2126_v25 = vld [vmem:[%s2021_s22 + $0xe8] sm:$0xff]   ;;  %v550_v50 = vsub.s32 %v547_v46, %v549_v40 }
  0x43   : > { %1478 = vmatpush3.bf16.msra.mxu0 %v2066_v10  ;;  %v2102_v19 = vld [vmem:[%s2021_s22 + $0x98] sm:$0xff]   ;;  %v2118_v23 = vld [vmem:[%s2021_s22 + $0xa0] sm:$0xff]   ;;  %v2130_v26 = vld [vmem:[%s2021_s22 + $0x28] sm:$0xff]   ;;  %v972_v51 = vsub.s32 %v969_v47, %v549_v40 }
  0x44   : > { %1500 = vmatpush3.bf16.msra.mxu1 %v2070_v11  ;;  %1479 = vmatprep.subr.bf16.mxu0 %v2074_v12  ;;  %v2134_v27 = vld [vmem:[%s2021_s22 + $0xa8] sm:$0xff]   ;;  %v2138_v28 = vld [vmem:[%s2021_s22 + $0x70] sm:$0xff]   ;;  %v2154_v32 = vld [vmem:[%s2021_s22 + $0x78] sm:$0xff]  }
  0x45   : > { %1501 = vmatprep.subr.bf16.mxu1 %v2078_v13  ;;  %v2142_v29 = vld [vmem:[%s2021_s22 + $0xf0] sm:$0xff]   ;;  %v2158_v34 = vld [vmem:[%s2021_s22 + $0xf8] sm:$0xff]  }
  0x46   : > { %v2146_v30 = vld [vmem:[%s2021_s22 + $0x30] sm:$0xff]   ;;  %v2162_v35 = vld [vmem:[%s2021_s22 + $0x38] sm:$0xff]  }
  0x47   : > { %1480 = vmatpush3.bf16.msra.mxu0 %v2082_v14  ;;  %v2150_v31 = vld [vmem:[%s2021_s22 + $0xb0] sm:$0xff]   ;;  %v2166_v36 = vld [vmem:[%s2021_s22 + $0xb8] sm:$0xff]  }
  0x48   : > { %1502 = vmatpush3.bf16.msra.mxu1 %v2086_v15  ;;  %1481 = vmatprep.subr.bf16.mxu0 %v2090_v16  ;;  %v541_v37 = vld [vmem:[%s449_s19] sm:$0xf] }
  0x49   : > { %1503 = vmatprep.subr.bf16.mxu1 %v2094_v17  ;;  %v540_v41 = vld [vmem:[%s440_s30] sm:$0xf]  ;;  %v992_v42 = vunpack.c.l.bf16 %v541_v37  ;;  %v551_v52 = vrot.slane %v541_v37, %v550_v50 }
  0x4a   : > { %v959_v45 = vunpack.c.l.bf16 %v540_v41  ;;  %v855_v53 = vrot.slane %v540_v41, %v550_v50 }
  0x4b   : > { %1482 = vmatpush3.bf16.msra.mxu0 %v2098_v18  ;;  %v999_v49 = vcombine.high %v992_v42, %v992_v42  ;;  %v2186_v56 = vrot.slane %v992_v42, %v972_v51  ;;  %v552_v58 = vcombine.high %v551_v52, %v551_v52  ;;  %v559_v59 = vrot.slane %v551_v52, %v550_v50 }
  0x4c   : > { %1504 = vmatpush3.bf16.msra.mxu1 %v2102_v19  ;;  %1483 = vmatprep.subr.bf16.mxu0 %v2106_v20  ;;  %v966_v48 = vcombine.high %v959_v45, %v959_v45  ;;  %v2182_v54 = vrot.slane %v959_v45, %v972_v51  ;;  %v856_v60 = vcombine.high %v855_v53, %v855_v53 }
  0x4d   : > { %1505 = vmatprep.subr.bf16.mxu1 %v2110_v21  ;;  %v2188_v57 = vrot.slane %v999_v49, %v972_v51  ;;  %v566_v61 = vrot.slane %v552_v58, %v550_v50  ;;  %v567_v63 = vcombine.high %v559_v59, %v559_v59  ;;  %v863_v3 = vrot.slane %v855_v53, %v550_v50 }
  0x4e   : > { %v2184_v55 = vrot.slane %v966_v48, %v972_v51  ;;  %v870_v62 = vrot.slane %v856_v60, %v550_v50  ;;  %v847_v48 = vld [vmem:[#allocation3] sm:$0x3]  ;;  %v1032_v60 = vld [vmem:[#allocation4] sm:$0x3] }
  0x4f   : > { %1484 = vmatpush3.bf16.msra.mxu0 %v2114_v22  ;;  %797 = vmatprep.mubr.bf16.mxu0 %v566_v61  ;;  %v568_v0 = vcombine.high %v566_v61, %v566_v61  ;;  %v871_v4 = vcombine.high %v863_v3, %v863_v3 }
  0x50   : > { %1506 = vmatpush3.bf16.msra.mxu1 %v2118_v23  ;;  %1485 = vmatprep.subr.bf16.mxu0 %v2122_v24  ;;  %v872_v1 = vcombine.high %v870_v62, %v870_v62 }
  0x51   : > { %1507 = vmatprep.subr.bf16.mxu1 %v2126_v25  ;;  %837 = vmatprep.mubr.bf16.mxu1 %v568_v0 }
  0x53   : > { %1486 = vmatpush3.bf16.msra.mxu0 %v2130_v26 }
  0x54   : > { %1508 = vmatpush3.bf16.msra.mxu1 %v2134_v27  ;;  %1487 = vmatprep.subr.bf16.mxu0 %v2138_v28 }
  0x55   : > { %1509 = vmatprep.subr.bf16.mxu1 %v2142_v29 }
  0x57   : > { %1488 = vmatpush3.bf16.msra.mxu0 %v2146_v30 }
  0x58   : > { %1510 = vmatpush3.bf16.msra.mxu1 %v2150_v31  ;;  %1489 = vmatprep.subr.bf16.mxu0 %v2154_v32 }
  0x59   : > { %1511 = vmatprep.subr.bf16.mxu1 %v2158_v34 }
  0x5b   : > { %1490 = vmatpush3.bf16.msra.mxu0 %v2162_v35 }
  0x5c   : > { %1512 = vmatpush3.bf16.msra.mxu1 %v2166_v36  ;;  %1519 = vmatprep.subr.bf16.mxu0 %v2043_v2 }
  0x5d   : > { %1541 = vmatprep.subr.bf16.mxu1 %v2046_v5 }
  0x5e   : > { %798 = vmatmul.mubr.bf16.vlgmr.msra.gmra.mrb[0].mxu0 %v559_v59 }
  0x5f   : > { %1520 = vmatpush3.bf16.msra.mxu0 %v2051_v6  ;;  %838 = vmatmul.mubr.bf16.vlgmr.msra.gmra.mrb[0].mxu1 %v567_v63 }
  0x60   : > { %1521 = vmatprep.subr.bf16.mxu0 %v2058_v8  ;;  %1542 = vmatpush3.bf16.msra.mxu1 %v2054_v7 }
  0x61   : > { %909 = vmatprep.mubr.bf16.mxu0 %v870_v62  ;;  %1543 = vmatprep.subr.bf16.mxu1 %v2062_v9 }
  0x62   : > { %949 = vmatprep.mubr.bf16.mxu1 %v872_v1  ;;  %v1160_v1 = vld [vmem:[%s2352_s6] sm:$0xff] (!%p1466_p7) }
  0x63   : > { %1522 = vmatpush3.bf16.msra.mxu0 %v2066_v10 }
  0x64   : > { %1523 = vmatprep.subr.bf16.mxu0 %v2074_v12  ;;  %1544 = vmatpush3.bf16.msra.mxu1 %v2070_v11 }
  0x65   : > { %1545 = vmatprep.subr.bf16.mxu1 %v2078_v13 }
  0x67   : > { %1524 = vmatpush3.bf16.msra.mxu0 %v2082_v14 }
  0x68   : > { %1525 = vmatprep.subr.bf16.mxu0 %v2090_v16  ;;  %1546 = vmatpush3.bf16.msra.mxu1 %v2086_v15 }
  0x69   : > { %1547 = vmatprep.subr.bf16.mxu1 %v2094_v17 }
  0x6b   : > { %1526 = vmatpush3.bf16.msra.mxu0 %v2098_v18 }
  0x6c   : > { %1527 = vmatprep.subr.bf16.mxu0 %v2106_v20  ;;  %1548 = vmatpush3.bf16.msra.mxu1 %v2102_v19 }
  0x6d   : > { %1549 = vmatprep.subr.bf16.mxu1 %v2110_v21 }
  0x6f   : > { %1528 = vmatpush3.bf16.msra.mxu0 %v2114_v22 }
  0x70   : > { %1529 = vmatprep.subr.bf16.mxu0 %v2122_v24  ;;  %1550 = vmatpush3.bf16.msra.mxu1 %v2118_v23 }
  0x71   : > { %1551 = vmatprep.subr.bf16.mxu1 %v2126_v25 }
  0x73   : > { %1530 = vmatpush3.bf16.msra.mxu0 %v2130_v26 }
  0x74   : > { %1531 = vmatprep.subr.bf16.mxu0 %v2138_v28  ;;  %1552 = vmatpush3.bf16.msra.mxu1 %v2134_v27 }
  0x75   : > { %1553 = vmatprep.subr.bf16.mxu1 %v2142_v29 }
  0x77   : > { %1532 = vmatpush3.bf16.msra.mxu0 %v2146_v30 }
  0x78   : > { %1533 = vmatprep.subr.bf16.mxu0 %v2154_v32  ;;  %1554 = vmatpush3.bf16.msra.mxu1 %v2150_v31 }
  0x79   : > { %1555 = vmatprep.subr.bf16.mxu1 %v2158_v34 }
  0x7b   : > { %1534 = vmatpush3.bf16.msra.mxu0 %v2162_v35 }
  0x7c   : > { %1563 = vmatprep.subr.bf16.mxu0 %v2043_v2  ;;  %1556 = vmatpush3.bf16.msra.mxu1 %v2166_v36 }
  0x7d   : > { %1585 = vmatprep.subr.bf16.mxu1 %v2046_v5  ;;  %v981_v5 = vcombine.high %v2182_v54, %v2182_v54 }
  0x7e   : > { %910 = vmatmul.mubr.bf16.vlgmr.msra.gmra.mrb[4].mxu0 %v863_v3  ;;  %v1161_v3 = vld [vmem:[%s2352_s6 + $0x8] sm:$0xff] (!%p1466_p7) }
  0x7f   : > { %1564 = vmatpush3.bf16.msra.mxu0 %v2051_v6  ;;  %950 = vmatmul.mubr.bf16.vlgmr.msra.gmra.mrb[4].mxu1 %v871_v4  ;;  %v982_v6 = vcombine.high %v2184_v55, %v2184_v55  ;;  %v1162_v4 = vld [vmem:[%s2352_s6 + $0x10] sm:$0xff] (!%p1466_p7) }
  0x80   : > { %1565 = vmatprep.subr.bf16.mxu0 %v2058_v8  ;;  %1586 = vmatpush3.bf16.msra.mxu1 %v2054_v7  ;;  %v1014_v7 = vcombine.high %v2186_v56, %v2186_v56  ;;  %v1015_v8 = vcombine.high %v2188_v57, %v2188_v57 }
  0x81   : > { %1587 = vmatprep.subr.bf16.mxu1 %v2062_v9 }
  0x83   : > { %1566 = vmatpush3.bf16.msra.mxu0 %v2066_v10 }
  0x84   : > { %1567 = vmatprep.subr.bf16.mxu0 %v2074_v12  ;;  %1588 = vmatpush3.bf16.msra.mxu1 %v2070_v11 }
  0x85   : > { %1589 = vmatprep.subr.bf16.mxu1 %v2078_v13 }
  0x87   : > { %1568 = vmatpush3.bf16.msra.mxu0 %v2082_v14 }
  0x88   : > { %1569 = vmatprep.subr.bf16.mxu0 %v2090_v16  ;;  %1590 = vmatpush3.bf16.msra.mxu1 %v2086_v15 }
  0x89   : > { %1591 = vmatprep.subr.bf16.mxu1 %v2094_v17 }
  0x8b   : > { %1570 = vmatpush3.bf16.msra.mxu0 %v2098_v18 }
  0x8c   : > { %1571 = vmatprep.subr.bf16.mxu0 %v2106_v20  ;;  %1592 = vmatpush3.bf16.msra.mxu1 %v2102_v19 }
  0x8d   : > { %1593 = vmatprep.subr.bf16.mxu1 %v2110_v21 }
  0x8f   : > { %1572 = vmatpush3.bf16.msra.mxu0 %v2114_v22 }
  0x90   : > { %1573 = vmatprep.subr.bf16.mxu0 %v2122_v24  ;;  %1594 = vmatpush3.bf16.msra.mxu1 %v2118_v23 }
  0x91   : > { %1595 = vmatprep.subr.bf16.mxu1 %v2126_v25 }
  0x93   : > { %1574 = vmatpush3.bf16.msra.mxu0 %v2130_v26 }
  0x94   : > { %1575 = vmatprep.subr.bf16.mxu0 %v2138_v28  ;;  %1596 = vmatpush3.bf16.msra.mxu1 %v2134_v27 }
  0x95   : > { %1597 = vmatprep.subr.bf16.mxu1 %v2142_v29 }
  0x97   : > { %1576 = vmatpush3.bf16.msra.mxu0 %v2146_v30 }
  0x98   : > { %1577 = vmatprep.subr.bf16.mxu0 %v2154_v32  ;;  %1598 = vmatpush3.bf16.msra.mxu1 %v2150_v31 }
  0x99   : > { %1599 = vmatprep.subr.bf16.mxu1 %v2158_v34 }
  0x9b   : > { %1578 = vmatpush3.bf16.msra.mxu0 %v2162_v35  ;;  %v543_v35 = vld [vmem:[#allocation2] sm:$0x3] }
  0x9c   : > { %1600 = vmatpush3.bf16.msra.mxu1 %v2166_v36 }
  0xbd   : > { %v963_v2 = vpop.permute.xlu0 %962 }
  0xbe   : > { %v987_v9 = vmul.f32 %v2182_v54, %v963_v2  ;;  %v988_v10 = vmul.f32 %v981_v5, %v963_v2  ;;  %v989_v11 = vmul.f32 %v2184_v55, %v963_v2  ;;  %v990_v12 = vmul.f32 %v982_v6, %v963_v2  ;;  %v1163_v6 = vld [vmem:[%s2352_s6 + $0x18] sm:$0xff] (!%p1466_p7) }
  0xbf   : > { %v1870_v2 = vmov (!%p1466_p7), 0.0|0.0   ;;  %v1660_v5 = vpack.c.bf16 (!%p1466_p7), %v1161_v3, %v1160_v1 }
  0xc0   : > { %1659 = vmatprep.subr.bf16.mxu0 (!%p1466_p7), %v1870_v2 }
  0xc1   : > { %v996_v13 = vpop.permute.xlu0 %995 }
  0xc2   : > { %v1020_v14 = vmul.f32 %v2186_v56, %v996_v13  ;;  %v1021_v15 = vmul.f32 %v1014_v7, %v996_v13  ;;  %v1022_v16 = vmul.f32 %v2188_v57, %v996_v13  ;;  %v1023_v17 = vmul.f32 %v1015_v8, %v996_v13  ;;  %v1167_v13 = vld [vmem:[%s2352_s6 + $0x38] sm:$0xff] (!%p1466_p7) }
  0xc3   : > { %v1872_v7 = vmov (!%p1466_p7), 0.0   ;;  %v1663_v8 = vpack.c.bf16 (!%p1466_p7), %v1163_v6, %v1162_v4 }
  0xc4   : > { %v1024_v18 = vadd.f32 %v1020_v14, %v987_v9  ;;  %v1026_v19 = vadd.f32 %v1022_v16, %v989_v11  ;;  %v1025_v20 = vadd.f32 %v1021_v15, %v988_v10  ;;  %v1027_v21 = vadd.f32 %v1023_v17, %v990_v12  ;;  %v1164_v9 = vld [vmem:[%s2352_s6 + $0x20] sm:$0xff] (!%p1466_p7)  ;;  %v1165_v10 = vld [vmem:[%s2352_s6 + $0x28] sm:$0xff] (!%p1466_p7)  ;;  %v1166_v12 = vld [vmem:[%s2352_s6 + $0x30] sm:$0xff] (!%p1466_p7) }
  0xc5   : > { %v1666_v11 = vpack.c.bf16 (!%p1466_p7), %v1165_v10, %v1164_v9  ;;  %v1669_v14 = vpack.c.bf16 (!%p1466_p7), %v1167_v13, %v1166_v12  ;;  %v1168_v15 = vld [vmem:[%s2352_s6 + $0x40] sm:$0xff] (!%p1466_p7)  ;;  %v1169_v16 = vld [vmem:[%s2352_s6 + $0x48] sm:$0xff] (!%p1466_p7) }
  0xc6   : > { %v1028_v22 = vpack.c.bf16 %v1024_v18, %v1024_v18  ;;  %v1030_v23 = vpack.c.bf16 %v1026_v19, %v1026_v19  ;;  %v1029_v24 = vpack.c.bf16 %v1025_v20, %v1025_v20  ;;  %v1031_v25 = vpack.c.bf16 %v1027_v21, %v1027_v21  ;;  %v1170_v18 = vld [vmem:[%s2352_s6 + $0x50] sm:$0xff] (!%p1466_p7)  ;;  %v1171_v19 = vld [vmem:[%s2352_s6 + $0x58] sm:$0xff] (!%p1466_p7)  ;;  %v1467_v20 = vld [vmem:[%s2350_s4] ss:$0 sm:$0xff] (!%p1466_p7) }
  0xc7   : > { %v1672_v17 = vpack.c.bf16 (!%p1466_p7), %v1169_v16, %v1168_v15 }
  0xc8   : > { %1065 = vmatprep.mubr.bf16.mxu0 %v1029_v24  ;;  %1105 = vmatprep.mubr.bf16.mxu1 %v1031_v25  ;;  %v1173_v24 = vld [vmem:[%s2352_s6 + $0x68] sm:$0xff] (!%p1466_p7) }
  0xc9   : > { %1066 = vmatmul.mubr.bf16.vlgmr.msra.gmra.mrb[8].mxu0 %v1028_v22  ;;  %1106 = vmatmul.mubr.bf16.vlgmr.msra.gmra.mrb[8].mxu1 %v1030_v23  ;;  %v1675_v22 = vpack.c.bf16 (!%p1466_p7), %v1171_v19, %v1170_v18  ;;  %v1172_v23 = vld [vmem:[%s2352_s6 + $0x60] sm:$0xff] (!%p1466_p7) }
  0xca   : > { %1656 = vmatprep.mubr.msk.f32.mxu0 (!%p1466_p7), %vm1871_vm0, %v1872_v7  ;;  %1661 = vmatpush3.bf16.msra.mxu0 (!%p1466_p7), %v1660_v5 }
  0xcb   : > { %1662 = vmatprep.subr.bf16.mxu0 (!%p1466_p7), %v1870_v2 }
  0xce   : > { %1664 = vmatpush3.bf16.msra.mxu0 (!%p1466_p7), %v1663_v8 }
  0xcf   : > { %1665 = vmatprep.subr.bf16.mxu0 (!%p1466_p7), %v1870_v2 }
  0xd2   : > { %1667 = vmatpush3.bf16.msra.mxu0 (!%p1466_p7), %v1666_v11 }
  0xd3   : > { %1668 = vmatprep.subr.bf16.mxu0 (!%p1466_p7), %v1870_v2 }
  0xd6   : > { %1670 = vmatpush3.bf16.msra.mxu0 (!%p1466_p7), %v1669_v14 }
  0xd7   : > { %1671 = vmatprep.subr.bf16.mxu0 (!%p1466_p7), %v1870_v2 }
  0xda   : > { %1673 = vmatpush3.bf16.msra.mxu0 (!%p1466_p7), %v1672_v17 }
  0xdb   : > { %1674 = vmatprep.subr.bf16.mxu0 (!%p1466_p7), %v1870_v2 }
  0xde   : > { %1676 = vmatpush3.bf16.msra.mxu0 (!%p1466_p7), %v1675_v22 }
  0xdf   : > { %1677 = vmatprep.subr.bf16.mxu0 (!%p1466_p7), %v1870_v2 }
 0x131   : > { %v1491_v26 = vpop.f32.mrb[0].mxu0 }
 0x132   : > { %v1492_v27 = vpop.f32.mrb[1].mxu0  ;;  %v1513_v28 = vpop.f32.mrb[0].mxu1 }
 0x133   : > { %v1493_v29 = vadd.f32 %v1492_v27, %v1491_v26  ;;  %v1494_v30 = vpop.f32.mrb[2].mxu0  ;;  %v1514_v31 = vpop.f32.mrb[1].mxu1  ;;  %v1678_v26 = vpack.c.bf16 (!%p1466_p7), %v1173_v24, %v1172_v23  ;;  %v1174_v27 = vld [vmem:[%s2352_s6 + $0x70] sm:$0xff] (!%p1466_p7) }
 0x134   : > { %v1495_v32 = vpop.f32.mrb[3].mxu0  ;;  %v1515_v33 = vadd.f32 %v1514_v31, %v1513_v28  ;;  %v1516_v34 = vpop.f32.mrb[2].mxu1  ;;  %v1175_v28 = vld [vmem:[%s2352_s6 + $0x78] sm:$0xff] (!%p1466_p7)  ;;  %v1468_v30 = vld [vmem:[%s2351_s5] ss:$0 sm:$0xff] (!%p1466_p7) }
 0x135   : > { %v1517_v36 = vpop.f32.mrb[3].mxu1  ;;  %1679 = vmatpush3.bf16.msra.mxu0 (!%p1466_p7), %v1678_v26  ;;  %v1873_v31 = vmov (!%p1466_p7), 0.2  }
 0x136   : > { %v840_v37 = vadd.f32 %v1515_v33, %v1493_v29  ;;  %v1681_v29 = vpack.c.bf16 (!%p1466_p7), %v1175_v28, %v1174_v27  ;;  %1680 = vmatprep.subr.bf16.mxu0 (!%p1466_p7), %v1870_v2 }
 0x138   : > { %v845_v38 = vadd.f32 %v840_v37, %v543_v35 }
 0x139   : > { %1682 = vmatpush3.bf16.msra.mxu0 (!%p1466_p7), %v1681_v29 }
 0x13a   : > { %846 = vst [vmem:[#allocation2] sm:$0x3] %v845_v38 }
 0x141   : > { %v1121_v34 = vld [vmem:[#allocation2] sm:$0x3] (!%p1466_p7) }
 0x142   : > { %v1128_v35 = vadd.f32 (!%p1466_p7), %v1467_v20, %v1121_v34 }
 0x144   : > { %v1132_v36 = vmul.f32 (!%p1466_p7), 0.2, %v1128_v35  ;;  %vm1131_vm2 = vcmp.gt.f32.partialorder (!%p1466_p7), %v1128_v35, 0.0 }
 0x146   : > { %v1133_v38 = vsel (!%p1466_p7), %vm1131_vm2, %v1128_v35, %v1132_v36 }
 0x151   : > { %v1535_v39 = vpop.f32.mrb[4].mxu0 }
 0x152   : > { %v1536_v40 = vpop.f32.mrb[5].mxu0  ;;  %v1557_v41 = vpop.f32.mrb[4].mxu1 }
 0x153   : > { %v1537_v42 = vadd.f32 %v1536_v40, %v1535_v39  ;;  %v1538_v43 = vpop.f32.mrb[6].mxu0  ;;  %v1558_v44 = vpop.f32.mrb[5].mxu1  ;;  %v1143_v40 = vmul.f32 (!%p1466_p7), %v1468_v30, %v1133_v38 }
 0x154   : > { %v1539_v45 = vpop.f32.mrb[7].mxu0  ;;  %v1559_v46 = vadd.f32 %v1558_v44, %v1557_v41  ;;  %v1560_v47 = vpop.f32.mrb[6].mxu1 }
 0x155   : > { %v1561_v49 = vpop.f32.mrb[7].mxu1 }
 0x156   : > { %v952_v50 = vadd.f32 %v1559_v46, %v1537_v42  ;;  %v1145_v42 = vsel (!%p1466_p7), %vm1144_vm3, %v1143_v40, 0.0 }
 0x157   : > { %1146 = vadd.xlane.f32.xlu0 (!%p1466_p7), %v1145_v42 }
 0x158   : > { %v957_v51 = vadd.f32 %v952_v50, %v847_v48 }
 0x15a   : > { %958 = vst [vmem:[#allocation3] sm:$0x3] %v957_v51 }
 0x161   : > { %v1129_v37 = vld [vmem:[#allocation3] sm:$0x3] (!%p1466_p7) }
 0x162   : > { %v1130_v39 = vadd.f32 (!%p1466_p7), %v1467_v20, %v1129_v37 }
 0x164   : > { %v1135_v41 = vmul.f32 (!%p1466_p7), 0.2, %v1130_v39  ;;  %vm1134_vm4 = vcmp.gt.f32.partialorder (!%p1466_p7), %v1130_v39, 0.0 }
 0x166   : > { %v1136_v43 = vsel (!%p1466_p7), %vm1134_vm4, %v1130_v39, %v1135_v41 }
 0x167   : > { %v1150_v44 = vmul.f32 (!%p1466_p7), %v1468_v30, %v1136_v43 }
 0x169   : > { %v1151_v45 = vsel (!%p1466_p7), %vm1144_vm3, %v1150_v44, 0.0 }
 0x16a   : > { %1152 = vadd.xlane.f32.xlu0 (!%p1466_p7), %v1151_v45 }
 0x19c   : > { %v1579_v52 = vpop.f32.mrb[8].mxu0  ;;  %v1601_v53 = vpop.f32.mrb[8].mxu1 }
 0x19d   : > { %v1580_v54 = vpop.f32.mrb[9].mxu0  ;;  %v1602_v55 = vpop.f32.mrb[9].mxu1 }
 0x19e   : > { %v1581_v56 = vadd.f32 %v1580_v54, %v1579_v52  ;;  %v1603_v57 = vadd.f32 %v1602_v55, %v1601_v53  ;;  %v1582_v58 = vpop.f32.mrb[10].mxu0  ;;  %v1604_v59 = vpop.f32.mrb[10].mxu1  ;;  %1118 = sbr.rel (%p1466_p7) target bundleno = 792 (0x318), region = 60 }
 0x19f   : > { %v1583_v61 = vpop.f32.mrb[11].mxu0  ;;  %v1605_v62 = vpop.f32.mrb[11].mxu1 }
 0x1a0   : > { %v1108_v63 = vadd.f32 %v1603_v57, %v1581_v56 }
 0x1a2   : > { %v1113_v0 = vadd.f32 %v1108_v63, %v1032_v60 }
 0x1a4   : > { %1114 = vst [vmem:[#allocation4] sm:$0x3] %v1113_v0 }
 0x1ab   : > { %v1155_v21 = vld [vmem:[#allocation4] sm:$0x3] }
 0x1ac   : > { %v1156_v25 = vadd.f32 %v1467_v20, %v1155_v21 }
 0x1ae   : > { %vm1157_vm1 = vcmp.gt.f32.partialorder %v1156_v25, 0.0 }
 0x1af   : > { %v1158_v32 = vsel %vm1157_vm1, 1.0, %v1873_v31 }
 0x1b0   : > { %v1159_v33 = vmul.f32 %v1468_v30, %v1158_v32 }
 0x1b2   : > { %1657 = vmatmul.mubr.f32.vlgmr.msra.gmra.mrb[0].mxu0 %v1159_v33 }
 0x1e4   : > { %v1147_v50 = vpop.xlane.xlu0 %1146 }
 0x1e5   : > { %1149 = vst.msk [vmem:[%s2353_s7] sm:$0x3] %vm1148_vm5, %v1147_v50 }
 0x1f7   : > { %v1153_v51 = vpop.xlane.xlu0 %1152 }
 0x1f8   : > { %1154 = vst.msk [vmem:[%s2354_s8] sm:$0x3] %vm1148_vm5, %v1153_v51 }
 0x285   : > { %v1242_v46 = vpop.f32.mrb[0].mxu0 }
 0x286   : > { %v1246_v47 = vmul.f32 %v1242_v46, %v1159_v33  ;;  %v1658_v48 = vpop.f32.mrb[1].mxu0 }
 0x288   : > { %v1247_v49 = vsel %vm1144_vm3, %v1246_v47, 0.0 }
 0x289   : > { %1248 = vadd.xlane.f32.xlu1 %v1247_v49 }
 0x316   : > { %v1249_v52 = vpop.xlane.xlu1 %1248 }
 0x317   : > { %1250 = vst.msk [vmem:[%s2355_s9] sm:$0x3] %vm1148_vm5, %v1249_v52 }
 0x318 PF: > { %s23_s14 = sadd.s32 1, %s1861_s14   ;;  %s2359_s30 = smov %s1845_s10 }
 0x319   : > { %p20_p5 = scmp.ge.s32.totalorder %s23_s14, 4   ;;  %s2360_s10 = smov %s1849_s11 }
 0x31a   : > { %s2361_s11 = smov %s1973_s21  ;;  %s2362_s12 = smov %s1857_s13 }
 0x31b   : > { %s2363_s13 = smov %s2365_s16  ;;  %22 = sbr.rel (!%p20_p5) target bundleno = 4 (0x4), region = 129 }
 0x322   :  { %1298 = vsyncpa [#allocation6], 1 }
 0x323   :  { %1300 = vsyncpa [#allocation6 + $0x1], 1 }

</bundles_post_ra>
